<compile_context>
chip_gen: v5e
topology: v5e:2x2
jax: 0.10.0
libtpu: 0.0.40
codegen_flags: <defaults>
</compile_context>

<pallas_src>
import functools

import jax
import jax.numpy as jnp
from jax.experimental import pallas as pl
from jax.experimental.pallas import tpu as pltpu

LANE = 128  # lane width: W3/b3 are padded to a multiple of this for the MXU


def _round_up(x, m):
    return (x + m - 1) // m * m


def decoder2_kernel(x_ref, w1_ref, c1_ref, w2_ref, c2_ref, w3_ref, b3_ref, o_ref,
                    *, num_classes):
    # x arrives f32 straight from HBM; cast to bf16 here (no wrapper-side pass).
    x = x_ref[...].astype(w1_ref.dtype)
    # Layer 1: Linear (BN folded into W1/c1) -> ReLU
    h = jnp.dot(x, w1_ref[...], preferred_element_type=jnp.float32) + c1_ref[...]
    h = jnp.maximum(h, 0.0)
    # Layer 2: Linear (BN folded into W2/c2) -> ReLU
    h = jnp.dot(h.astype(w2_ref.dtype), w2_ref[...],
                preferred_element_type=jnp.float32) + c2_ref[...]
    h = jnp.maximum(h, 0.0)
    # Output layer: MXU matmul into a lane-padded register tile, then store only
    # the num_classes real columns — HBM writeback is (tb, num_classes), not a
    # padded 128-wide f32 slab.
    out = (jnp.dot(h.astype(w3_ref.dtype), w3_ref[...],
                   preferred_element_type=jnp.float32) + b3_ref[...])
    o_ref[...] = out[:, :num_classes].astype(o_ref.dtype)


def prepare_params(params, compute_dtype=jnp.bfloat16):
    """One-time prep: fold BN affine into linear weights/biases, pad W3/b3 to 128 lanes.

    Call this once at model-load time; decoder2_forward takes the prepared tuple.
    """
    (w1, b1, s1, t1, w2, b2, s2, t2, w3, b3) = params
    w1f = (w1 * s1).astype(compute_dtype)
    c1 = (b1 * s1 + t1).astype(jnp.float32)
    w2f = (w2 * s2).astype(compute_dtype)
    c2 = (b2 * s2 + t2).astype(jnp.float32)
    n = w3.shape[1]
    n_pad = _round_up(n, LANE)
    w3p = jnp.zeros((w3.shape[0], n_pad), jnp.float32).at[:, :n].set(w3)
    w3p = w3p.astype(compute_dtype)
    b3p = jnp.zeros((1, n_pad), jnp.float32).at[:, :n].set(b3)
    return (w1f, c1, w2f, c2, w3p, b3p), n


def _pick_tb(B, block_b):
    """Batch tile size.

    Small B: a single tile rounded up to the f32 sublane multiple (8).
    Large B: multiple of 256 (full-height MXU passes on v6e/v7x, multiple of 128
    for v5e), capped so the grid has at least 2 steps -> megacore on v7x.
    """
    if B < 512:
        return _round_up(B, 8)
    return max(256, min(block_b, _round_up(pl.cdiv(B, 2), 256)))


def decoder2_forward(x, prepared, num_classes, *, block_b=1024):
    """x: (B, in_dim) float32.  prepared: output of prepare_params."""
    w1, c1, w2, c2, w3, b3 = prepared
    B, in_dim = x.shape
    hid1 = w1.shape[1]
    hid2 = w2.shape[1]
    n_pad = w3.shape[1]

    tb = _pick_tb(B, block_b)
    grid = (pl.cdiv(B, tb),)  # ragged last tile is fine: OOB rows are never written

    w_item = jnp.dtype(w1.dtype).itemsize
    cost = pl.CostEstimate(
        flops=2 * B * (in_dim * hid1 + hid1 * hid2 + hid2 * n_pad),
        transcendentals=0,
        bytes_accessed=(B * in_dim * 4                                   # x in (f32)
                        + B * num_classes * 4                            # out (narrow)
                        + (in_dim * hid1 + hid1 * hid2 + hid2 * n_pad) * w_item
                        + (hid1 + hid2 + n_pad) * 4))

    const = lambda i: (0, 0)  # weights/biases: one block, resident across grid steps
    out = pl.pallas_call(
        functools.partial(decoder2_kernel, num_classes=num_classes),
        out_shape=jax.ShapeDtypeStruct((B, num_classes), jnp.float32),
        grid=grid,
        in_specs=[
            pl.BlockSpec((tb, in_dim), lambda i: (i, 0)),
            pl.BlockSpec(w1.shape, const),
            pl.BlockSpec(c1.shape, const),
            pl.BlockSpec(w2.shape, const),
            pl.BlockSpec(c2.shape, const),
            pl.BlockSpec(w3.shape, const),
            pl.BlockSpec(b3.shape, const),
        ],
        out_specs=pl.BlockSpec((tb, num_classes), lambda i: (i, 0)),
        compiler_params=pltpu.CompilerParams(
            dimension_semantics=("parallel",),
            vmem_limit_bytes=32 * 1024 * 1024),  # raise v5e's 16 MiB scoped default
        cost_estimate=cost,
    )(x, w1, c1, w2, c2, w3, b3)
    return out


def fold_bn(gamma, beta, mean, var, eps=1e-5):
    scale = gamma / jnp.sqrt(var + eps)
    shift = beta - mean * scale
    return scale.reshape(1, -1), shift.reshape(1, -1)


def init_params(key, in_dim, num_classes=2):
    ks = jax.random.split(key, 12)

    def linear(kw, kb, fan_in, fan_out):
        bound = 1.0 / jnp.sqrt(fan_in)
        w = jax.random.uniform(kw, (fan_in, fan_out), jnp.float32, -bound, bound)
        b = jax.random.uniform(kb, (1, fan_out), jnp.float32, -bound, bound)
        return w, b

    w1, b1 = linear(ks[0], ks[1], in_dim, 256)
    w2, b2 = linear(ks[2], ks[3], 256, 128)
    w3, b3 = linear(ks[4], ks[5], 128, num_classes)

    # BatchNorm1d params (deterministic, non-trivial) — eval-mode running stats.
    g1 = 1.0 + 0.1 * jax.random.normal(ks[6], (256,), jnp.float32)
    be1 = 0.1 * jax.random.normal(ks[7], (256,), jnp.float32)
    m1 = 0.1 * jax.random.normal(ks[8], (256,), jnp.float32)
    v1 = jnp.abs(1.0 + 0.1 * jax.random.normal(ks[9], (256,), jnp.float32))
    g2 = jnp.ones((128,), jnp.float32)
    be2 = jnp.zeros((128,), jnp.float32)
    m2 = 0.1 * jax.random.normal(ks[10], (128,), jnp.float32)
    v2 = jnp.abs(1.0 + 0.1 * jax.random.normal(ks[11], (128,), jnp.float32))

    s1, t1 = fold_bn(g1, be1, m1, v1)
    s2, t2 = fold_bn(g2, be2, m2, v2)
    return (w1, b1, s1, t1, w2, b2, s2, t2, w3, b3)


def decoder2_reference_f32(x, params):
    """Full-precision reference of the original module (eval mode, p=0)."""
    (w1, b1, s1, t1, w2, b2, s2, t2, w3, b3) = params
    h = jnp.maximum((x @ w1 + b1) * s1 + t1, 0.0)
    h = jnp.maximum((h @ w2 + b2) * s2 + t2, 0.0)
    return h @ w3 + b3


def decoder2_reference_bf16(x, prepared, num_classes):
    """Reference using the same folded bf16 weights / f32 accumulation as the kernel."""
    w1, c1, w2, c2, w3, b3 = prepared
    h = jnp.dot(x.astype(jnp.bfloat16), w1, preferred_element_type=jnp.float32) + c1
    h = jnp.maximum(h, 0.0)
    h = jnp.dot(h.astype(jnp.bfloat16), w2, preferred_element_type=jnp.float32) + c2
    h = jnp.maximum(h, 0.0)
    out = jnp.dot(h.astype(jnp.bfloat16), w3, preferred_element_type=jnp.float32) + b3
    return out[:, :num_classes]


if __name__ == "__main__":
    B, in_dim, num_classes = 8, 32, 2
    key = jax.random.PRNGKey(0)
    k_x, k_p = jax.random.split(key)
    x = jax.random.normal(k_x, (B, in_dim), jnp.float32)
    params = init_params(k_p, in_dim, num_classes)

    # One-time parameter prep (hoisted out of the forward path).
    prepared, nc = prepare_params(params)
    prepared = jax.block_until_ready(prepared)

    out = decoder2_forward(x, prepared, nc)
    out = jax.block_until_ready(out)
    assert out.shape == (B, num_classes)

    # Tight check against an identically-quantized pure-JAX reference.
    ref_bf16 = decoder2_reference_bf16(x, prepared, nc)
    assert jnp.allclose(out, ref_bf16, atol=2e-3, rtol=2e-3)

    # Loose check against the full-precision module semantics (bf16 matmul error).
    ref_f32 = decoder2_reference_f32(x, params)
    assert jnp.allclose(out, ref_f32, atol=5e-2, rtol=5e-2)

    print("KERNEL_OK")
</pallas_src>

<mosaic_0001>
module attributes {stable_mosaic.version = 11 : i64} {
  func.func @decoder2_kernel(%arg0: i32, %arg1: memref<8x32xf32, #tpu.memory_space<vmem>>, %arg2: memref<32x256xbf16, #tpu.memory_space<vmem>>, %arg3: memref<1x256xf32, #tpu.memory_space<vmem>>, %arg4: memref<256x128xbf16, #tpu.memory_space<vmem>>, %arg5: memref<1x128xf32, #tpu.memory_space<vmem>>, %arg6: memref<128x128xbf16, #tpu.memory_space<vmem>>, %arg7: memref<1x128xf32, #tpu.memory_space<vmem>>, %arg8: memref<8x2xf32, #tpu.memory_space<vmem>>) attributes {dimension_semantics = [#tpu.dimension_semantics<parallel>], iteration_bounds = array<i64: 1>, scalar_prefetch = 0 : i64, scratch_operands = 0 : i64, tpu.core_type = #tpu.core_type<tc>, window_params = [{transform_indices = @transform_0, window_bounds = array<i64: 8, 32>}, {pipeline_mode = #tpu.pipeline_mode<synchronous>, transform_indices = @transform_1, window_bounds = array<i64: 32, 256>}, {pipeline_mode = #tpu.pipeline_mode<synchronous>, transform_indices = @transform_2, window_bounds = array<i64: 1, 256>}, {pipeline_mode = #tpu.pipeline_mode<synchronous>, transform_indices = @transform_3, window_bounds = array<i64: 256, 128>}, {pipeline_mode = #tpu.pipeline_mode<synchronous>, transform_indices = @transform_4, window_bounds = array<i64: 1, 128>}, {pipeline_mode = #tpu.pipeline_mode<synchronous>, transform_indices = @transform_5, window_bounds = array<i64: 128, 128>}, {pipeline_mode = #tpu.pipeline_mode<synchronous>, transform_indices = @transform_6, window_bounds = array<i64: 1, 128>}, {transform_indices = @transform_7, window_bounds = array<i64: 8, 2>}]} {
    %c0 = arith.constant 0 : index
    %c0_0 = arith.constant 0 : index
    %0 = vector.load %arg1[%c0, %c0_0] : memref<8x32xf32, #tpu.memory_space<vmem>>, vector<8x32xf32>
    %1 = arith.truncf %0 : vector<8x32xf32> to vector<8x32xbf16>
    %c0_1 = arith.constant 0 : index
    %c0_2 = arith.constant 0 : index
    %2 = vector.load %arg2[%c0_1, %c0_2] : memref<32x256xbf16, #tpu.memory_space<vmem>>, vector<32x256xbf16>
    %cst = arith.constant dense<0.000000e+00> : vector<8x256xf32>
    %3 = tpu.matmul %1, %2, %cst {dimension_numbers = #tpu.dot_dimension_numbers<[1], [0], [0], [1], [0, 0, 1, 1], [], []>} : vector<8x32xbf16>, vector<32x256xbf16>, vector<8x256xf32> -> vector<8x256xf32>
    %c0_3 = arith.constant 0 : index
    %c0_4 = arith.constant 0 : index
    %4 = vector.load %arg3[%c0_3, %c0_4] : memref<1x256xf32, #tpu.memory_space<vmem>>, vector<1x256xf32>
    %5 = vector.broadcast %4 : vector<1x256xf32> to vector<8x256xf32>
    %6 = arith.addf %3, %5 : vector<8x256xf32>
    %cst_5 = arith.constant 0.000000e+00 : f32
    %7 = vector.broadcast %cst_5 : f32 to vector<8x256xf32>
    %8 = arith.maximumf %6, %7 : vector<8x256xf32>
    %9 = arith.truncf %8 : vector<8x256xf32> to vector<8x256xbf16>
    %c0_6 = arith.constant 0 : index
    %c0_7 = arith.constant 0 : index
    %10 = vector.load %arg4[%c0_6, %c0_7] : memref<256x128xbf16, #tpu.memory_space<vmem>>, vector<256x128xbf16>
    %cst_8 = arith.constant dense<0.000000e+00> : vector<8x128xf32>
    %11 = tpu.matmul %9, %10, %cst_8 {dimension_numbers = #tpu.dot_dimension_numbers<[1], [0], [0], [1], [0, 0, 1, 1], [], []>} : vector<8x256xbf16>, vector<256x128xbf16>, vector<8x128xf32> -> vector<8x128xf32>
    %c0_9 = arith.constant 0 : index
    %c0_10 = arith.constant 0 : index
    %12 = vector.load %arg5[%c0_9, %c0_10] : memref<1x128xf32, #tpu.memory_space<vmem>>, vector<1x128xf32>
    %13 = vector.broadcast %12 : vector<1x128xf32> to vector<8x128xf32>
    %14 = arith.addf %11, %13 : vector<8x128xf32>
    %cst_11 = arith.constant 0.000000e+00 : f32
    %15 = vector.broadcast %cst_11 : f32 to vector<8x128xf32>
    %16 = arith.maximumf %14, %15 : vector<8x128xf32>
    %17 = arith.truncf %16 : vector<8x128xf32> to vector<8x128xbf16>
    %c0_12 = arith.constant 0 : index
    %c0_13 = arith.constant 0 : index
    %18 = vector.load %arg6[%c0_12, %c0_13] : memref<128x128xbf16, #tpu.memory_space<vmem>>, vector<128x128xbf16>
    %cst_14 = arith.constant dense<0.000000e+00> : vector<8x128xf32>
    %19 = tpu.matmul %17, %18, %cst_14 {dimension_numbers = #tpu.dot_dimension_numbers<[1], [0], [0], [1], [0, 0, 1, 1], [], []>} : vector<8x128xbf16>, vector<128x128xbf16>, vector<8x128xf32> -> vector<8x128xf32>
    %c0_15 = arith.constant 0 : index
    %c0_16 = arith.constant 0 : index
    %20 = vector.load %arg7[%c0_15, %c0_16] : memref<1x128xf32, #tpu.memory_space<vmem>>, vector<1x128xf32>
    %21 = vector.broadcast %20 : vector<1x128xf32> to vector<8x128xf32>
    %22 = arith.addf %19, %21 : vector<8x128xf32>
    %23 = vector.extract_strided_slice %22 {offsets = [0, 0], sizes = [8, 2], strides = [1, 1]} : vector<8x128xf32> to vector<8x2xf32>
    %c0_17 = arith.constant 0 : index
    %c0_18 = arith.constant 0 : index
    %24 = vector.load %arg8[%c0_17, %c0_18] : memref<8x2xf32, #tpu.memory_space<vmem>>, vector<8x2xf32>
    tpu.vector_store %arg8[%c0_17, %c0_18], %23 {strides = array<i32>} : memref<8x2xf32, #tpu.memory_space<vmem>>, vector<8x2xf32>,
    return
  }
  func.func @transform_0(%arg0: i32) -> (i32, i32) {
    %c0_i32 = arith.constant 0 : i32
    %c0_i32_0 = arith.constant 0 : i32
    return %arg0, %c0_i32 : i32, i32
  }
  func.func @transform_1(%arg0: i32) -> (i32, i32) {
    %c0_i32 = arith.constant 0 : i32
    %c0_i32_0 = arith.constant 0 : i32
    %c0_i32_1 = arith.constant 0 : i32
    return %c0_i32, %c0_i32_0 : i32, i32
  }
  func.func @transform_2(%arg0: i32) -> (i32, i32) {
    %c0_i32 = arith.constant 0 : i32
    %c0_i32_0 = arith.constant 0 : i32
    %c0_i32_1 = arith.constant 0 : i32
    return %c0_i32, %c0_i32_0 : i32, i32
  }
  func.func @transform_3(%arg0: i32) -> (i32, i32) {
    %c0_i32 = arith.constant 0 : i32
    %c0_i32_0 = arith.constant 0 : i32
    %c0_i32_1 = arith.constant 0 : i32
    return %c0_i32, %c0_i32_0 : i32, i32
  }
  func.func @transform_4(%arg0: i32) -> (i32, i32) {
    %c0_i32 = arith.constant 0 : i32
    %c0_i32_0 = arith.constant 0 : i32
    %c0_i32_1 = arith.constant 0 : i32
    return %c0_i32, %c0_i32_0 : i32, i32
  }
  func.func @transform_5(%arg0: i32) -> (i32, i32) {
    %c0_i32 = arith.constant 0 : i32
    %c0_i32_0 = arith.constant 0 : i32
    %c0_i32_1 = arith.constant 0 : i32
    return %c0_i32, %c0_i32_0 : i32, i32
  }
  func.func @transform_6(%arg0: i32) -> (i32, i32) {
    %c0_i32 = arith.constant 0 : i32
    %c0_i32_0 = arith.constant 0 : i32
    %c0_i32_1 = arith.constant 0 : i32
    return %c0_i32, %c0_i32_0 : i32, i32
  }
  func.func @transform_7(%arg0: i32) -> (i32, i32) {
    %c0_i32 = arith.constant 0 : i32
    %c0_i32_0 = arith.constant 0 : i32
    return %arg0, %c0_i32 : i32, i32
  }
}

</mosaic_0001>

<bundles_post_ra>
// kernel: tpu_custom_call.1
= control target key start
LH: loop header
LB: loop body
LE: loop exit
PB: predicated region body
PF: predicated region fallthrough
CT: control target
= control target key end

     0   :  { %12 = vsyncpa [#allocation3], 0  ;;  %s769_s0 = inlined_call_operand.hbm [shape: f32[8,32], index: 0, kind: input, shape index: {}]   ;;  %s770_s1 = inlined_call_operand.hbm [shape: bf16[32,256], index: 1, kind: input, shape index: {}]   ;;  %s771_s2 = inlined_call_operand.hbm [shape: f32[1,256], index: 2, kind: input, shape index: {}]   ;;  %s772_s3 = inlined_call_operand.hbm [shape: bf16[256,128], index: 3, kind: input, shape index: {}]   ;;  %s773_s4 = inlined_call_operand.vmem [shape: f32[1,128], index: 4, kind: input, shape index: {}]   ;;  %s774_s5 = inlined_call_operand.hbm [shape: bf16[128,128], index: 5, kind: input, shape index: {}]   ;;  %s775_s6 = inlined_call_operand.vmem [shape: f32[1,128], index: 6, kind: input, shape index: {}]   ;;  %s776_s7 = inlined_call_operand.vmem [shape: f32[8,2], index: 7, kind: output, shape index: {}]  }
   0x1   :  { %13 = vsyncpa [#allocation5], 0  ;;  %s30_s26 = sshll.u32 %s770_s1, 4  ;;  %s31_s26 = int_to_ptr.hbm [resolvable:$true] %s30_s26 }
   0x2   :  { %14 = vsyncpa [#allocation8], 0  ;;  %s696_s27 = smov [#allocation4]   ;;  %s54_s8 = sshll.u32 %s772_s3, 4  ;;  %s55_s8 = int_to_ptr.hbm [resolvable:$true] %s54_s8 }
   0x3   :  { %s32_s28 = sshll.u32 %s696_s27, 4  ;;  %s697_s9 = smov 128   ;;  %s33_s28 = int_to_ptr.vmem [resolvable:$true] %s32_s28 }
   0x4   :  { %s698_s10 = smov 8   ;;  %s699_s11 = smov [#allocation7]  }
   0x5   :  { %38 = dma.hbm_to_vmem [thread:$0]  %s31_s26, 512, %s33_s28, [#allocation5], %s697_s9, %s697_s9, %s698_s10  }
   0x6   :  { %s56_s12 = sshll.u32 %s699_s11, 4  ;;  %s700_s13 = smov 64   ;;  %s57_s12 = int_to_ptr.vmem [resolvable:$true] %s56_s12 }
   0x7   :  { %s701_s14 = smov 4   ;;  %s20_s16 = sshll.u32 %s769_s0, 4  ;;  %s21_s16 = int_to_ptr.hbm [resolvable:$true] %s20_s16 }
   0x8   :  { %62 = dma.hbm_to_vmem [thread:$0]  %s55_s8, 2048, %s57_s12, [#allocation8], %s700_s13, %s700_s13, %s701_s14  }
   0x9   :  { %s702_s17 = smov [#allocation2]   ;;  %s44_s20 = sshll.u32 %s771_s2, 4  ;;  %s45_s20 = int_to_ptr.hbm [resolvable:$true] %s44_s20 }
   0xa   :  { %s22_s18 = sshll.u32 %s702_s17, 4  ;;  %s703_s21 = smov [#allocation6]   ;;  %s23_s18 = int_to_ptr.vmem [resolvable:$true] %s22_s18 }
   0xb   :  { %25 = dma.hbm_to_vmem [thread:$0]  %s21_s16, 128, %s23_s18, [#allocation3]  }
   0xc   :  { %s46_s22 = sshll.u32 %s703_s21, 4  ;;  %s69_s25 = sshll.u32 %s774_s5, 4  ;;  %s47_s22 = int_to_ptr.vmem [resolvable:$true] %s46_s22  ;;  %s70_s25 = int_to_ptr.hbm [resolvable:$true] %s69_s25 }
   0xd   :  { %49 = dma.hbm_to_vmem [thread:$0]  %s45_s20, 32, %s47_s22, [#allocation5]  }
   0xe   :  { %s704_s0 = smov [#allocation9]  }
   0xf   :  { %s71_s26 = sshll.u32 %s704_s0, 4  ;;  %s72_s26 = int_to_ptr.vmem [resolvable:$true] %s71_s26 }
  0x10   :  { %77 = dma.hbm_to_vmem [thread:$0]  %s70_s25, 1024, %s72_s26, [#allocation8], %s700_s13, %s700_s13, %s701_s14  }
  0x11   :  { %690 = dma.done.wait [#allocation3], 128  }
  0x12   :  { %691 = vsyncadd [#allocation3], 4294967168 }
  0x13   :  { %692 = dma.done.wait [#allocation5], 544  }
  0x14   :  { %693 = vsyncadd [#allocation5], 4294966752 }
  0x15   :  { %694 = dma.done.wait [#allocation8], 3072  }
  0x16   :  { %695 = vsyncadd [#allocation8], 4294964224  ;;  %v427_v0 = vld [vmem:[#allocation4 + $0x10] sm:$0xf]  ;;  %v534_v1 = vld [vmem:[#allocation4 + $0x14] sm:$0xf0] }
  0x17   :  { %v419_v2 = vld [vmem:[#allocation4] sm:$0xf]  ;;  %v428_v3 = vor.u32 %v534_v1, %v427_v0  ;;  %v532_v4 = vld [vmem:[#allocation4 + $0x4] sm:$0xf0]  ;;  %v533_v5 = vld [vmem:[#allocation4 + $0x14] sm:$0xf] }
  0x18   :  { %v429_v6 = vld [vmem:[#allocation4 + $0x18] sm:$0xf0]  ;;  %v420_v7 = vor.u32 %v532_v4, %v419_v2  ;;  %v531_v12 = vld [vmem:[#allocation4 + $0x4] sm:$0xf]  ;;  %v421_v13 = vld [vmem:[#allocation4 + $0x8] sm:$0xf0] }
  0x19   :  { %143 = vmatpush.bf16.msra.mxu1 %v428_v3  ;;  %v101_v8 = vld [vmem:[#allocation2] sm:$0xff]  ;;  %v432_v10 = vor.u32 %v533_v5, %v429_v6  ;;  %vm133_vm0 = vcmask 261120   ;;  %v424_v17 = vor.u32 %v531_v12, %v421_v13  ;;  %v540_v18 = vld [vmem:[#allocation7 + $0x28] sm:$0xff]  ;;  %v539_v19 = vld [vmem:[#allocation7 + $0x20] sm:$0xff]  ;;  %vm408_vm1 = vcmask 15360  }
  0x1a   :  { %v542_v9 = vld [vmem:[#allocation7 + $0x38] sm:$0xff]  ;;  %v541_v14 = vld [vmem:[#allocation7 + $0x30] sm:$0xff]  ;;  %v102_v15 = vpack.c.bf16 %v101_v8, %v101_v8  ;;  %v536_v22 = vld [vmem:[#allocation7 + $0x8] sm:$0xff] }
  0x1b   :  { %v550_v11 = vld [vmem:[#allocation7 + $0x78] sm:$0xff]  ;;  %299 = vmatpush.bf16.msra.mxu2 %v542_v9  ;;  %v549_v16 = vld [vmem:[#allocation7 + $0x70] sm:$0xff]  ;;  %v548_v23 = vld [vmem:[#allocation7 + $0x68] sm:$0xff] }
  0x1c   :  { %312 = vmatpush.bf16.msra.mxu3 %v550_v11  ;;  %v538_v20 = vld [vmem:[#allocation7 + $0x18] sm:$0xff]  ;;  %v537_v21 = vld [vmem:[#allocation7 + $0x10] sm:$0xff]  ;;  %v535_v24 = vld [vmem:[#allocation7] sm:$0xff] }
  0x1d   :  { %144 = vmatpush.bf16.msra.mxu1 %v420_v7  ;;  %v547_v25 = vld [vmem:[#allocation7 + $0x60] sm:$0xff]  ;;  %v546_v26 = vld [vmem:[#allocation7 + $0x58] sm:$0xff]  ;;  %v545_v27 = vld [vmem:[#allocation7 + $0x50] sm:$0xff] }
  0x1e   :  { %v544_v28 = vld [vmem:[#allocation7 + $0x48] sm:$0xff]  ;;  %v543_v29 = vld [vmem:[#allocation7 + $0x40] sm:$0xff]  ;;  %v558_v30 = vld [vmem:[#allocation9 + $0x38] sm:$0xff] }
  0x1f   :  { %300 = vmatpush.bf16.msra.mxu2 %v541_v14  ;;  %v107_v31 = vld [vmem:[#allocation6] sm:$0x3]  ;;  %395 = vmatpush.bf16.msra.mxu0 %v558_v30  ;;  %v557_v32 = vld [vmem:[#allocation9 + $0x30] sm:$0xff]  ;;  %v556_v45 = vld [vmem:[#allocation9 + $0x28] sm:$0xff] }
  0x20   :  { %433 = vmatmul.msk.bf16.vlgmr.msra.gmra.mxu1 %vm133_vm0, %v102_v15  ;;  %313 = vmatpush.bf16.msra.mxu3 %v549_v16  ;;  %v109_v33 = vperm.slane %v107_v31, 0  ;;  %v110_v39 = vperm.slane %v107_v31, 1  ;;  %v555_v46 = vld [vmem:[#allocation9 + $0x20] sm:$0xff]  ;;  %v554_v47 = vld [vmem:[#allocation9 + $0x18] sm:$0xff]  ;;  %v553_v48 = vld [vmem:[#allocation9 + $0x10] sm:$0xff] }
  0x21   :  { %156 = vmatpush.bf16.msrb.mxu1 %v432_v10  ;;  %v552_v49 = vld [vmem:[#allocation9 + $0x8] sm:$0xff]  ;;  %v551_v50 = vld [vmem:[#allocation9] sm:$0xff]  ;;  %v568_v53 = vld [vmem:[%s773_s4] ss:$0 sm:$0xff] }
  0x22   :  { %v569_v60 = vld [vmem:[%s775_s6] ss:$0 sm:$0xff] }
  0x23   :  { %301 = vmatpush.bf16.msra.mxu2 %v540_v18  ;;  %396 = vmatpush.bf16.msra.mxu0 %v557_v32 }
  0x24   :  { %314 = vmatpush.bf16.msra.mxu3 %v548_v23 }
  0x25   :  { %157 = vmatpush.bf16.msrb.mxu1 %v424_v17 }
  0x27   :  { %302 = vmatpush.bf16.msra.mxu2 %v539_v19  ;;  %397 = vmatpush.bf16.msra.mxu0 %v556_v45 }
  0x28   :  { %315 = vmatpush.bf16.msra.mxu3 %v547_v25 }
  0x2b   :  { %303 = vmatpush.bf16.msra.mxu2 %v538_v20  ;;  %398 = vmatpush.bf16.msra.mxu0 %v555_v46 }
  0x2c   :  { %316 = vmatpush.bf16.msra.mxu3 %v546_v26 }
  0x2f   :  { %304 = vmatpush.bf16.msra.mxu2 %v537_v21  ;;  %399 = vmatpush.bf16.msra.mxu0 %v554_v47 }
  0x30   :  { %434 = vmatmul.msk.bf16.vlgmr.msrb.gmra.mxu1 %vm133_vm0, %v102_v15  ;;  %317 = vmatpush.bf16.msra.mxu3 %v545_v27 }
  0x33   :  { %305 = vmatpush.bf16.msra.mxu2 %v536_v22  ;;  %400 = vmatpush.bf16.msra.mxu0 %v553_v48 }
  0x34   :  { %318 = vmatpush.bf16.msra.mxu3 %v544_v28 }
  0x37   :  { %306 = vmatpush.bf16.msra.mxu2 %v535_v24  ;;  %401 = vmatpush.bf16.msra.mxu0 %v552_v49 }
  0x38   :  { %319 = vmatpush.bf16.msra.mxu3 %v543_v29 }
  0x3b   :  { %402 = vmatpush.bf16.msra.mxu0 %v551_v50 }
  0x9d   :  { %v146_v34 = vpop.f32.mrf.mxu1 }
  0x9e   :  { %v147_v35 = vadd.f32 %v146_v34, %v109_v33 }
  0xa0   :  { %v163_v36 = vmax.f32 %v147_v35, 0.0 }
  0xa2   :  { %v165_v37 = vpack.c.bf16 %v163_v36, %v163_v36 }
  0xa4   :  { %307 = vmatmul.bf16.vlgmr.msra.gmra.mxu2 %v165_v37 }
  0xa5   :  { %v148_v38 = vpop.f32.mrf.mxu1 }
  0xad   :  { %v159_v40 = vpop.f32.mrf.mxu1 }
  0xae   :  { %v160_v41 = vadd.f32 %v159_v40, %v110_v39 }
  0xb0   :  { %v164_v42 = vmax.f32 %v160_v41, 0.0 }
  0xb2   :  { %v166_v43 = vpack.c.bf16 %v164_v42, %v164_v42 }
  0xb4   :  { %320 = vmatmul.bf16.vlgmr.msra.gmra.mxu3 %v166_v43 }
  0xb5   :  { %v161_v44 = vpop.f32.mrf.mxu1 }
 0x127   :  { %v308_v51 = vpop.f32.mrf.mxu2 }
 0x128   :  { %v309_v54 = vadd.f32 %v568_v53, %v308_v51 }
 0x12f   :  { %v310_v52 = vpop.f32.mrf.mxu2 }
 0x137   :  { %v321_v55 = vpop.f32.mrf.mxu3 }
 0x138   :  { %v322_v56 = vadd.f32 %v321_v55, %v309_v54 }
 0x13a   :  { %v325_v57 = vmax.f32 %v322_v56, 0.0 }
 0x13c   :  { %v326_v58 = vpack.c.bf16 %v325_v57, %v325_v57 }
 0x13e   :  { %403 = vmatmul.bf16.vlgmr.msra.gmra.mxu0 %v326_v58 }
 0x13f   :  { %v323_v59 = vpop.f32.mrf.mxu3 }
 0x1bb   :  { %v404_v61 = vpop.f32.mrf.mxu0 }
 0x1bc   :  { %v405_v62 = vadd.f32 %v569_v60, %v404_v61 }
 0x1be   :  { %409 = vst.msk [vmem:[%s776_s7] sm:$0xff] %vm408_vm1, %v405_v62 }
 0x1c3   :  { %v406_v63 = vpop.f32.mrf.mxu0 }
 0x1c4   :  { %414 = vsyncpa [#allocation3], 1 }
 0x1c5   :  { %415 = vsyncpa [#allocation5], 1 }
 0x1c6   :  { %416 = vsyncpa [#allocation8], 1 }

</bundles_post_ra>
